<compile_context>
chip_gen: v5e
topology: v5e:2x2
jax: 0.10.0
libtpu: 0.0.40
codegen_flags: <defaults>
</compile_context>

<pallas_src>
import math

import jax
import jax.numpy as jnp
from jax.experimental import pallas as pl
from jax.experimental.pallas import tpu as pltpu


def _mul_kernel(h_ref, w_ref, o_ref):
    # Elementwise multiply of the current tile on the VPU.
    o_ref[...] = h_ref[...] * w_ref[...]


def _mul_bcast_kernel(h_ref, w_ref, o_ref):
    # h_ref/o_ref are (1, tm, tn) blocks of the batched input; w_ref is (tm, tn)
    # and is re-used (stays VMEM-resident) across the inner batch grid axis.
    o_ref[0] = h_ref[0] * w_ref[...]


# ---- tiling policy -----------------------------------------------------------
_SMALL_BYTES = 512 * 1024              # per-array: below this, skip the grid pipeline
_VMEM_TILE_BUDGET = 24 * 1024 * 1024   # 3 arrays x 2 pipeline buffers x tile <= this (v7x-safe)
_VMEM_LIMIT_BYTES = 32 * 1024 * 1024   # explicit scoped-VMEM limit (v5e default is only 16 MiB)
_MEGACORE_MIN_BYTES = 2 * 1024 * 1024  # above this, guarantee >=2 grid steps for v7x's 2 TCs
_FLAT_LANE_CANDIDATES = (2048, 1024, 512, 256, 128)  # flattened lane widths (multiples of 128)


def _sublane_multiple(dtype):
    # Sub-32-bit dtypes pack along sublanes: f32 -> 8, bf16 -> 16, int8/fp8 -> 32.
    itemsize = jnp.dtype(dtype).itemsize
    return max(8, 32 // itemsize)


def _round_down(x, m):
    return (x // m) * m


def _round_up(x, m):
    return -(-x // m) * m


def _choose_flat_row_tile(R, L, itemsize, sublane):
    """Row tile for the flattened (R, L) view."""
    max_tm = _VMEM_TILE_BUDGET // (6 * L * itemsize)   # 3 arrays x 2 buffers
    tm = min(R, max(sublane, _round_down(max_tm, sublane)))
    total_bytes = R * L * itemsize
    if total_bytes >= _MEGACORE_MIN_BYTES:
        g = pl.cdiv(R, tm)
        if g < 2:
            # Give v7x's second TensorCore something to do.
            tm = min(R, max(sublane, _round_up(pl.cdiv(R, 2), sublane)))
            g = pl.cdiv(R, tm)
        if g > 1 and g % 2 == 1:
            # Prefer an even step count so the two TCs stay balanced.
            tm_try = max(sublane, _round_up(pl.cdiv(R, g + 1), sublane))
            if pl.cdiv(R, tm_try) % 2 == 0:
                tm = tm_try
    return tm


def _tiled_2d_call(h, weight, tm, tn):
    M, F = h.shape
    grid = (pl.cdiv(M, tm), pl.cdiv(F, tn))
    spec = pl.BlockSpec((tm, tn), lambda i, j: (i, j))
    return pl.pallas_call(
        _mul_kernel,
        out_shape=jax.ShapeDtypeStruct((M, F), h.dtype),
        grid_spec=pltpu.PrefetchScalarGridSpec(
            num_scalar_prefetch=0,
            grid=grid,
            in_specs=[spec, spec],
            out_specs=spec,
        ),
        compiler_params=pltpu.CompilerParams(
            dimension_semantics=("parallel", "parallel"),
            vmem_limit_bytes=_VMEM_LIMIT_BYTES,
        ),
    )(h, weight)


def _batched_forward(h, weight, *, tm=None, tn=None):
    """h: (B, in_feature, out_feature); weight: (in_feature, out_feature)."""
    B, M, F = h.shape
    dtype = h.dtype
    itemsize = jnp.dtype(dtype).itemsize
    sublane = _sublane_multiple(dtype)

    # Feature (lane) tile: prefer full rows (one contiguous DMA per step).
    if tn is None:
        if 6 * sublane * F * itemsize <= _VMEM_TILE_BUDGET:
            tn = F
        else:
            tn = max(128, _round_down(_VMEM_TILE_BUDGET // (6 * sublane * itemsize), 128))
    tn = min(tn, F)
    if tn != F:
        tn = _round_down(tn, 128) or F
    # Row (sublane) tile.
    if tm is None:
        max_tm = _VMEM_TILE_BUDGET // (6 * tn * itemsize)
        tm = min(M, max(sublane, _round_down(max_tm, sublane)))
    tm = min(tm, M)
    if tm != M:
        tm = _round_down(tm, sublane) or M

    # Batch is the innermost grid axis so the broadcast weight block stays
    # VMEM-resident across it: HBM traffic is ~1 read + 1 write per h element
    # plus a single small weight read (instead of pre-broadcasting weight).
    grid = (pl.cdiv(M, tm), pl.cdiv(F, tn), B)
    h_spec = pl.BlockSpec((1, tm, tn), lambda i, j, b: (b, i, j))
    w_spec = pl.BlockSpec((tm, tn), lambda i, j, b: (i, j))
    return pl.pallas_call(
        _mul_bcast_kernel,
        out_shape=jax.ShapeDtypeStruct((B, M, F), dtype),
        grid_spec=pltpu.PrefetchScalarGridSpec(
            num_scalar_prefetch=0,
            grid=grid,
            in_specs=[h_spec, w_spec],
            out_specs=h_spec,
        ),
        compiler_params=pltpu.CompilerParams(
            dimension_semantics=("parallel", "parallel", "arbitrary"),
            vmem_limit_bytes=_VMEM_LIMIT_BYTES,
        ),
    )(h, weight)


def embedding_weight_forward(h, weight, *, tm=None, tn=None):
    """out = h * weight (EmbeddingWeight.forward).

    weight is (in_feature, out_feature).  h is either the same shape, or
    (batch, in_feature, out_feature) -- the broadcast is handled by the
    BlockSpec index_map without materializing weight to h's size.
    """
    h = jnp.asarray(h)
    weight = jnp.asarray(weight)
    assert weight.ndim == 2
    assert h.dtype == weight.dtype

    if h.ndim == 3 and h.shape[1:] == weight.shape:
        return _batched_forward(h, weight, tm=tm, tn=tn)
    assert h.ndim == 2 and h.shape == weight.shape

    M, F = h.shape
    dtype = h.dtype
    itemsize = jnp.dtype(dtype).itemsize
    sublane = _sublane_multiple(dtype)
    total_bytes = M * F * itemsize
    out_shape = jax.ShapeDtypeStruct((M, F), dtype)

    # Tiny operands (e.g. the module's own (16, 128) weight): one VMEM-resident
    # block, no grid => no per-step pipeline overhead.
    if tm is None and tn is None and total_bytes <= _SMALL_BYTES:
        return pl.pallas_call(_mul_kernel, out_shape=out_shape)(h, weight)

    # Preferred auto path: flatten (M, F) -> (R, L) and run a 1-D parallel row
    # grid.  The op is purely elementwise so the wrapper-side reshape is free
    # for row-major arrays; blocks are lane-dense and every DMA is contiguous.
    if tm is None and tn is None:
        n = M * F
        for L in _FLAT_LANE_CANDIDATES:
            if n % L == 0 and n >= L:
                R = n // L
                tm_flat = _choose_flat_row_tile(R, L, itemsize, sublane)
                spec = pl.BlockSpec((tm_flat, L), lambda i: (i, 0))
                out = pl.pallas_call(
                    _mul_kernel,
                    out_shape=jax.ShapeDtypeStruct((R, L), dtype),
                    grid_spec=pltpu.PrefetchScalarGridSpec(
                        num_scalar_prefetch=0,
                        grid=(pl.cdiv(R, tm_flat),),
                        in_specs=[spec, spec],
                        out_specs=spec,
                    ),
                    compiler_params=pltpu.CompilerParams(
                        dimension_semantics=("parallel",),
                        vmem_limit_bytes=_VMEM_LIMIT_BYTES,
                    ),
                )(h.reshape(R, L), weight.reshape(R, L))
                return out.reshape(M, F)

    # Fallback / user-tiled path: 2-D (row, feature) grid.  Prefer full-row
    # feature tiles (tn == F) so each pipeline step is one contiguous DMA.
    if tn is None:
        if 6 * sublane * F * itemsize <= _VMEM_TILE_BUDGET:
            tn_sel = F
        else:
            tn_sel = max(128, _round_down(_VMEM_TILE_BUDGET // (6 * sublane * itemsize), 128))
            tn_sel = min(tn_sel, F)
    else:
        tn_sel = min(tn, F)
    if tn_sel != F:
        tn_sel = _round_down(tn_sel, 128) or F

    if tm is None:
        max_tm = _VMEM_TILE_BUDGET // (6 * tn_sel * itemsize)
        tm_sel = min(M, max(sublane, _round_down(max_tm, sublane)))
        if (total_bytes >= _MEGACORE_MIN_BYTES
                and pl.cdiv(M, tm_sel) * pl.cdiv(F, tn_sel) < 2):
            tm_sel = min(M, max(sublane, _round_up(pl.cdiv(M, 2), sublane)))
    else:
        tm_sel = min(tm, M)
    if tm_sel != M:
        tm_sel = _round_down(tm_sel, sublane) or M

    return _tiled_2d_call(h, weight, tm_sel, tn_sel)


def xavier_uniform_relu(key, in_feature, out_feature, dtype=jnp.float32):
    # Matches nn.init.xavier_uniform_(w, gain=calculate_gain('relu')):
    # gain = sqrt(2); bound = gain * sqrt(6 / (fan_in + fan_out)).
    gain = math.sqrt(2.0)
    bound = gain * math.sqrt(6.0 / (in_feature + out_feature))
    return jax.random.uniform(
        key, (in_feature, out_feature), dtype=dtype, minval=-bound, maxval=bound
    )


if __name__ == "__main__":
    key = jax.random.PRNGKey(0)
    k_w, k_h, k_w2, k_h2, k_hb = jax.random.split(key, 5)

    # 1) The module's own small shape -> single-block (no-grid) fast path.
    in_feature, out_feature = 16, 128
    weight = xavier_uniform_relu(k_w, in_feature, out_feature)
    h = jax.random.normal(k_h, (in_feature, out_feature), dtype=jnp.float32)
    out = jax.block_until_ready(embedding_weight_forward(h, weight))
    assert out.shape == (in_feature, out_feature) and out.dtype == jnp.float32
    assert jnp.allclose(out, h * weight, atol=1e-6, rtol=1e-6)

    # 2) A modestly larger shape -> flattened lane-dense 1-D grid path (auto),
    #    and forced small tiles -> the 2-D pipelined multi-step grid path.
    M2, F2 = 512, 768
    w2 = xavier_uniform_relu(k_w2, M2, F2)
    h2 = jax.random.normal(k_h2, (M2, F2), dtype=jnp.float32)
    out2 = jax.block_until_ready(embedding_weight_forward(h2, w2))
    assert jnp.allclose(out2, h2 * w2, atol=1e-6, rtol=1e-6)
    out2b = jax.block_until_ready(embedding_weight_forward(h2, w2, tm=64, tn=256))
    assert jnp.allclose(out2b, h2 * w2, atol=1e-6, rtol=1e-6)

    # 3) PyTorch-style broadcast: batched h against the 2-D weight, handled via
    #    the index_map (weight is never materialized to h's size).
    hb = jax.random.normal(k_hb, (2, in_feature, out_feature), dtype=jnp.float32)
    outb = jax.block_until_ready(embedding_weight_forward(hb, weight))
    assert jnp.allclose(outb, hb * weight[None], atol=1e-6, rtol=1e-6)

    print("KERNEL_OK")
</pallas_src>

<mosaic_0001>
module attributes {stable_mosaic.version = 11 : i64} {
  func.func @_mul_kernel(%arg0: memref<16x128xf32, #tpu.memory_space<vmem>>, %arg1: memref<16x128xf32, #tpu.memory_space<vmem>>, %arg2: memref<16x128xf32, #tpu.memory_space<vmem>>) attributes {dimension_semantics = [], scalar_prefetch = 0 : i64, scratch_operands = 0 : i64, tpu.core_type = #tpu.core_type<tc>} {
    %c0 = arith.constant 0 : index
    %c0_0 = arith.constant 0 : index
    %0 = vector.load %arg0[%c0, %c0_0] : memref<16x128xf32, #tpu.memory_space<vmem>>, vector<16x128xf32>
    %c0_1 = arith.constant 0 : index
    %c0_2 = arith.constant 0 : index
    %1 = vector.load %arg1[%c0_1, %c0_2] : memref<16x128xf32, #tpu.memory_space<vmem>>, vector<16x128xf32>
    %2 = arith.mulf %0, %1 : vector<16x128xf32>
    %c0_3 = arith.constant 0 : index
    %c0_4 = arith.constant 0 : index
    %3 = vector.load %arg2[%c0_3, %c0_4] : memref<16x128xf32, #tpu.memory_space<vmem>>, vector<16x128xf32>
    tpu.vector_store %arg2[%c0_3, %c0_4], %2 {strides = array<i32>} : memref<16x128xf32, #tpu.memory_space<vmem>>, vector<16x128xf32>,
    return
  }
}

</mosaic_0001>

<bundles_post_ra>
// kernel: tpu_custom_call.1
= control target key start
LH: loop header
LB: loop body
LE: loop exit
PB: predicated region body
PF: predicated region fallthrough
CT: control target
= control target key end

     0   :  { %7 = vsyncpa [#allocation3], 0  ;;  %s184_s0 = inlined_call_operand.hbm [shape: f32[16,128], index: 0, kind: input, shape index: {}]   ;;  %s185_s1 = inlined_call_operand.hbm [shape: f32[16,128], index: 1, kind: input, shape index: {}]   ;;  %s186_s2 = inlined_call_operand.hbm [shape: f32[16,128], index: 2, kind: output, shape index: {}]  }
   0x1   :  { %8 = vsyncpa [#allocation6], 0 }
   0x2   :  { %9 = vsyncpa [#allocation4], 0  ;;  %s14_s11 = sshll.u32 %s184_s0, 4  ;;  %s155_s12 = smov [#allocation2]   ;;  %s15_s11 = int_to_ptr.hbm [resolvable:$true] %s14_s11 }
   0x3   :  { %s16_s13 = sshll.u32 %s155_s12, 4  ;;  %s27_s16 = sshll.u32 %s185_s1, 4  ;;  %s17_s13 = int_to_ptr.vmem [resolvable:$true] %s16_s13  ;;  %s28_s16 = int_to_ptr.hbm [resolvable:$true] %s27_s16 }
   0x4   :  { %s156_s17 = smov 128   ;;  %s157_s18 = smov 8  }
   0x5   :  { %22 = dma.hbm_to_vmem [thread:$0]  %s15_s11, 256, %s17_s13, [#allocation3], %s156_s17, %s156_s17, %s157_s18  }
   0x6   :  { %s158_s19 = smov [#allocation5]  }
   0x7   :  { %s29_s20 = sshll.u32 %s158_s19, 4  ;;  %s30_s20 = int_to_ptr.vmem [resolvable:$true] %s29_s20 }
   0x8   :  { %35 = dma.hbm_to_vmem [thread:$0]  %s28_s16, 256, %s30_s20, [#allocation6], %s156_s17, %s156_s17, %s157_s18  }
   0x9   :  { %149 = dma.done.wait [#allocation3], 256  }
   0xa   :  { %150 = vsyncadd [#allocation3], 4294967040 }
   0xb   :  { %151 = dma.done.wait [#allocation6], 256  }
   0xc   :  { %152 = vsyncadd [#allocation6], 4294967040  ;;  %s159_s0 = smov [#allocation7]   ;;  %s58_s24 = sshll.u32 %s186_s2, 4  ;;  %v44_v0 = vld [vmem:[#allocation2] sm:$0xff]  ;;  %v46_v1 = vld [vmem:[#allocation5] sm:$0xff]  ;;  %s59_s24 = int_to_ptr.hbm [resolvable:$true] %s58_s24 }
   0xd   :  { %s56_s21 = sshll.u32 %s159_s0, 4  ;;  %v45_v2 = vld [vmem:[#allocation2 + $0x8] sm:$0xff]  ;;  %v48_v3 = vmul.f32 %v46_v1, %v44_v0  ;;  %v47_v4 = vld [vmem:[#allocation5 + $0x8] sm:$0xff]  ;;  %s57_s21 = int_to_ptr.vmem [resolvable:$true] %s56_s21 }
   0xe   :  { %v49_v5 = vmul.f32 %v47_v4, %v45_v2 }
   0xf   :  { %50 = vst [vmem:[#allocation7] sm:$0xff] %v48_v3 }
  0x10   :  { %51 = vst [vmem:[#allocation7 + $0x8] sm:$0xff] %v49_v5 }
  0x11   :  { %64 = dma.vmem_to_hbm [thread:$0]  %s57_s21, 256, %s59_s24, [#allocation4], %s156_s17, %s156_s17, %s157_s18  }
  0x12   :  { %153 = dma.done.wait [#allocation4], 256  }
  0x13   :  { %154 = vsyncadd [#allocation4], 4294967040 }
  0x14   :  { %69 = vsyncpa [#allocation3], 1 }
  0x15   :  { %70 = vsyncpa [#allocation6], 1 }
  0x16   :  { %71 = vsyncpa [#allocation4], 1 }

</bundles_post_ra>
